<compile_context>
chip_gen: v6e
topology: v6e:2x2x1
jax: 0.10.0
libtpu: 0.0.40
codegen_flags: <defaults>
</compile_context>

<pallas_src>
import functools

import jax
import jax.numpy as jnp
from jax.experimental import pallas as pl
from jax.experimental.pallas import tpu as pltpu

_MiB = 1024 * 1024
_LANE = 128


def _rmsnorm_bias_kernel(x_ref, w_ref, b_ref, o_ref, *, eps, inv_n):
    # Small resident params first, out of the way of the big tile math.
    w = w_ref[...].astype(jnp.float32)                    # (1, H)
    b = b_ref[...].astype(jnp.float32)                    # (1, H)
    # Compute in float32 regardless of input dtype (matches torch .to(float32)).
    x = x_ref[...].astype(jnp.float32)                    # (TM, H)
    # sum * (1/H) with the reciprocal folded as a constant (padded columns are zero,
    # inv_n uses the true hidden size, so padding does not perturb the variance).
    var = jnp.sum(x * x, axis=-1, keepdims=True) * inv_n  # (TM, 1) -> VPU + XLU reduce
    inv = jax.lax.rsqrt(var + eps)                        # EUP
    o_ref[...] = (w * (x * inv) - b).astype(o_ref.dtype)


def _hw_info():
    """(per-TensorCore VMEM bytes, TensorCores per chip).  Conservative fallbacks."""
    vmem_cap = 64 * _MiB          # conservative fallback = v7x per-TC
    num_tc = 1
    try:
        info = pltpu.get_tpu_info()
        cap = getattr(info, "vmem_capacity_bytes", None)
        if cap:
            vmem_cap = int(cap)
    except Exception:
        pass
    try:
        kind = jax.devices()[0].device_kind.lower()
        if "v7" in kind:
            num_tc = 2                                    # 2 TCs/chip on v7x
            vmem_cap = min(vmem_cap, 64 * _MiB)           # guard against per-chip reporting
        elif "v5" in kind or "v6" in kind:
            num_tc = 1                                    # single TC: no megacore sharding
            vmem_cap = min(vmem_cap, 128 * _MiB)
    except Exception:
        pass
    return vmem_cap, num_tc


def _bytes_per_row(hidden, itemsize):
    # 2x input block + 2x output block (double-buffered, native dtype)
    # + ~3 f32 (TM, H) intermediates the body materializes (x_f32, x*x / normed, f32 result).
    return 4 * hidden * itemsize + 3 * hidden * 4


def _vmem_need_bytes(tm, hidden, itemsize):
    io_db = 4 * tm * hidden * itemsize        # double-buffered in + out blocks
    temps = 3 * tm * hidden * 4               # f32 intermediates
    params = 2 * 2 * hidden * 4               # weight + bias rows (worst case f32, dbuf)
    return io_db + temps + params + 2 * _MiB  # small fixed headroom


def _choose_block_rows(rows, hidden, itemsize, vmem_cap, num_tc):
    budget = (vmem_cap * 3) // 4              # ~75% of per-TC VMEM for this kernel
    per_row = max(_bytes_per_row(hidden, itemsize), 1)
    tm = budget // per_row
    # Byte-based cap on the native-dtype input block (replaces the old 1024-row cap):
    # keeps per-block DMA in the multi-MiB sweet spot without starving small-hidden inputs.
    max_block_bytes = 16 * _MiB
    tm = min(tm, max_block_bytes // max(hidden * itemsize, 1))
    tm = int(min(tm, rows))
    if rows < 8:
        return max(rows, 1)                   # full-dim block (8-sublane exemption)
    tm = max(8, (tm // 8) * 8)                # sublane-aligned
    if num_tc > 1 and rows > 8:
        # Multi-TC (v7x): guarantee a balanced, num_tc-divisible number of grid steps so the
        # "parallel" axis shards evenly across both TensorCores.
        steps = pl.cdiv(rows, tm)
        steps = max(num_tc, ((steps + num_tc - 1) // num_tc) * num_tc)
        tm_bal = max(8, ((pl.cdiv(rows, steps) + 7) // 8) * 8)
        tm = min(tm, tm_bal)
    return max(tm, 8)


def llama_rmsnorm_bias(x, weight, bias, eps=1e-5, block_rows=None):
    """x: [..., hidden]; weight, bias: [hidden]. Returns same shape/dtype as x."""
    orig_shape = x.shape
    hidden = orig_shape[-1]
    rows = 1
    for d in orig_shape[:-1]:
        rows *= d

    x2d = x.reshape(rows, hidden)
    w2d = weight.reshape(1, hidden)
    b2d = bias.reshape(1, hidden)

    # Lane-dense output stores: pad hidden to a multiple of 128 if needed (zeros -> exact math
    # since the variance divides by the true hidden size; padded output columns are sliced off).
    pad_h = (-hidden) % _LANE
    hidden_p = hidden + pad_h
    if pad_h:
        x2d = jnp.pad(x2d, ((0, 0), (0, pad_h)))
        w2d = jnp.pad(w2d, ((0, 0), (0, pad_h)))
        b2d = jnp.pad(b2d, ((0, 0), (0, pad_h)))

    itemsize = jnp.dtype(x.dtype).itemsize
    vmem_cap, num_tc = _hw_info()

    if block_rows is None:
        tm = _choose_block_rows(rows, hidden_p, itemsize, vmem_cap, num_tc)
    else:
        tm = max(1, min(int(block_rows), rows))

    # If the working set would exceed capacity, shrink the tile (never just clamp the limit).
    while tm > 8 and _vmem_need_bytes(tm, hidden_p, itemsize) > vmem_cap - 4 * _MiB:
        tm = max(8, ((tm // 2) // 8) * 8)

    grid = (pl.cdiv(rows, tm),)
    need = _vmem_need_bytes(tm, hidden_p, itemsize)
    vmem_limit = int(max(16 * _MiB, min(vmem_cap - 2 * _MiB, max(need, 32 * _MiB))))

    out = pl.pallas_call(
        functools.partial(_rmsnorm_bias_kernel, eps=float(eps), inv_n=1.0 / float(hidden)),
        out_shape=jax.ShapeDtypeStruct((rows, hidden_p), x.dtype),
        grid_spec=pl.GridSpec(
            grid=grid,
            in_specs=[
                pl.BlockSpec((tm, hidden_p), lambda i: (i, 0)),   # x row tile
                pl.BlockSpec((1, hidden_p), lambda i: (0, 0)),    # weight (resident)
                pl.BlockSpec((1, hidden_p), lambda i: (0, 0)),    # bias   (resident)
            ],
            out_specs=pl.BlockSpec((tm, hidden_p), lambda i: (i, 0)),
        ),
        compiler_params=pltpu.CompilerParams(
            dimension_semantics=("parallel",),
            vmem_limit_bytes=vmem_limit,
        ),
    )(x2d, w2d, b2d)

    if pad_h:
        out = out[:, :hidden]
    return out.reshape(orig_shape)


def _reference(x, weight, bias, eps=1e-5):
    xf = x.astype(jnp.float32)
    var = jnp.mean(xf * xf, axis=-1, keepdims=True)
    normed = xf * jax.lax.rsqrt(var + eps)
    return (weight.astype(jnp.float32) * normed - bias.astype(jnp.float32)).astype(x.dtype)


if __name__ == "__main__":
    key = jax.random.PRNGKey(0)
    batch, seq, hidden = 2, 8, 128

    kx, kw, kb = jax.random.split(key, 3)
    x = jax.random.normal(kx, (batch, seq, hidden), dtype=jnp.float32)
    # Module __init__ uses ones for weight and bias; perturb slightly so the test is
    # non-trivial but still deterministic.
    weight = jnp.ones((hidden,), dtype=jnp.float32) + 0.01 * jax.random.normal(kw, (hidden,))
    bias = jnp.ones((hidden,), dtype=jnp.float32) + 0.01 * jax.random.normal(kb, (hidden,))

    out = llama_rmsnorm_bias(x, weight, bias, eps=1e-5)
    out = jax.block_until_ready(out)

    ref = _reference(x, weight, bias, eps=1e-5)
    assert out.shape == x.shape and out.dtype == x.dtype
    assert jnp.allclose(out, ref, atol=1e-5, rtol=1e-5), "mismatch vs reference"
    print("KERNEL_OK")
</pallas_src>

<mosaic_0001>
module attributes {stable_mosaic.version = 11 : i64} {
  func.func @_rmsnorm_bias_kernel(%arg0: i32, %arg1: memref<16x128xf32, #tpu.memory_space<vmem>>, %arg2: memref<1x128xf32, #tpu.memory_space<vmem>>, %arg3: memref<1x128xf32, #tpu.memory_space<vmem>>, %arg4: memref<16x128xf32, #tpu.memory_space<vmem>>) attributes {dimension_semantics = [#tpu.dimension_semantics<parallel>], iteration_bounds = array<i64: 1>, scalar_prefetch = 0 : i64, scratch_operands = 0 : i64, tpu.core_type = #tpu.core_type<tc>, window_params = [{transform_indices = @transform_0, window_bounds = array<i64: 16, 128>}, {pipeline_mode = #tpu.pipeline_mode<synchronous>, transform_indices = @transform_1, window_bounds = array<i64: 1, 128>}, {pipeline_mode = #tpu.pipeline_mode<synchronous>, transform_indices = @transform_2, window_bounds = array<i64: 1, 128>}, {transform_indices = @transform_3, window_bounds = array<i64: 16, 128>}]} {
    %c0 = arith.constant 0 : index
    %c0_0 = arith.constant 0 : index
    %0 = vector.load %arg2[%c0, %c0_0] : memref<1x128xf32, #tpu.memory_space<vmem>>, vector<1x128xf32>
    %c0_1 = arith.constant 0 : index
    %c0_2 = arith.constant 0 : index
    %1 = vector.load %arg3[%c0_1, %c0_2] : memref<1x128xf32, #tpu.memory_space<vmem>>, vector<1x128xf32>
    %c0_3 = arith.constant 0 : index
    %c0_4 = arith.constant 0 : index
    %2 = vector.load %arg1[%c0_3, %c0_4] : memref<16x128xf32, #tpu.memory_space<vmem>>, vector<16x128xf32>
    %3 = arith.mulf %2, %2 : vector<16x128xf32>
    %cst = arith.constant dense<0.000000e+00> : vector<16xf32>
    %4 = vector.multi_reduction <add>, %3, %cst [1] : vector<16x128xf32> to vector<16xf32>
    %5 = vector.shape_cast %4 : vector<16xf32> to vector<16x1xf32>
    %cst_5 = arith.constant 7.812500e-03 : f32
    %6 = vector.broadcast %cst_5 : f32 to vector<16x1xf32>
    %7 = arith.mulf %5, %6 : vector<16x1xf32>
    %cst_6 = arith.constant 9.99999974E-6 : f32
    %8 = vector.broadcast %cst_6 : f32 to vector<16x1xf32>
    %9 = arith.addf %7, %8 : vector<16x1xf32>
    %10 = math.rsqrt %9 : vector<16x1xf32>
    %11 = vector.broadcast %10 : vector<16x1xf32> to vector<16x128xf32>
    %12 = arith.mulf %2, %11 : vector<16x128xf32>
    %13 = vector.broadcast %0 : vector<1x128xf32> to vector<16x128xf32>
    %14 = arith.mulf %13, %12 : vector<16x128xf32>
    %15 = vector.broadcast %1 : vector<1x128xf32> to vector<16x128xf32>
    %16 = arith.subf %14, %15 : vector<16x128xf32>
    %c0_7 = arith.constant 0 : index
    %c0_8 = arith.constant 0 : index
    %17 = vector.load %arg4[%c0_7, %c0_8] : memref<16x128xf32, #tpu.memory_space<vmem>>, vector<16x128xf32>
    tpu.vector_store %arg4[%c0_7, %c0_8], %16 {strides = array<i32>} : memref<16x128xf32, #tpu.memory_space<vmem>>, vector<16x128xf32>,
    return
  }
  func.func @transform_0(%arg0: i32) -> (i32, i32) {
    %c0_i32 = arith.constant 0 : i32
    %c0_i32_0 = arith.constant 0 : i32
    return %arg0, %c0_i32 : i32, i32
  }
  func.func @transform_1(%arg0: i32) -> (i32, i32) {
    %c0_i32 = arith.constant 0 : i32
    %c0_i32_0 = arith.constant 0 : i32
    %c0_i32_1 = arith.constant 0 : i32
    return %c0_i32, %c0_i32_0 : i32, i32
  }
  func.func @transform_2(%arg0: i32) -> (i32, i32) {
    %c0_i32 = arith.constant 0 : i32
    %c0_i32_0 = arith.constant 0 : i32
    %c0_i32_1 = arith.constant 0 : i32
    return %c0_i32, %c0_i32_0 : i32, i32
  }
  func.func @transform_3(%arg0: i32) -> (i32, i32) {
    %c0_i32 = arith.constant 0 : i32
    %c0_i32_0 = arith.constant 0 : i32
    return %arg0, %c0_i32 : i32, i32
  }
}

</mosaic_0001>

<bundles_post_ra>
// kernel: tpu_custom_call.1
= control target key start
LH: loop header
LB: loop body
LE: loop exit
PB: predicated region body
PF: predicated region fallthrough
CT: control target
= control target key end

     0   :  { %8 = vsyncpa [#allocation3], 0  ;;  %s178_s0 = inlined_call_operand.hbm [shape: f32[16,128], index: 0, kind: input, shape index: {}]   ;;  %s179_s1 = inlined_call_operand.vmem [shape: f32[1,128], index: 1, kind: input, shape index: {}]   ;;  %s180_s2 = inlined_call_operand.vmem [shape: f32[1,128], index: 2, kind: input, shape index: {}]   ;;  %s181_s3 = inlined_call_operand.hbm [shape: f32[16,128], index: 3, kind: output, shape index: {}]  }
   0x1   :  { %9 = vsyncpa [#allocation4], 0  ;;  %s136_s12 = smov [#allocation2]  }
   0x2   :  { %s15_s13 = sshll.u32 %s136_s12, 4  ;;  %s16_s13 = int_to_ptr.vmem [resolvable:$true] %s15_s13 }
   0x3   :  { %s100_s14 = scalar_lea.vmem %s16_s13, 256  ;;  %p105_p1 = scmp.lt.s32.totalorder %s16_s13, %s16_s13 }
   0x4   :  { %p101_p0 = scmp.ne.s32.totalorder %s16_s13, %s100_s14  ;;  %p106_p2 = scmp.lt.s32.totalorder %s100_s14, %s100_s14 }
   0x6   :  { %p107_p3 = por %p106_p2, %p105_p1 }
   0x8   :  { %p108_p4 = pnand %p107_p3, %p101_p0 }
   0xa   :  { %111 = shalt.err (!%p108_p4)
}
   0xb   :  { %s137_s15 = smov 128   ;;  %s138_s16 = smov 8  }
   0xc   :  { %21 = dma.hbm_to_vmem [thread:$0]  %s178_s0, 256, %s16_s13, [#allocation3], %s137_s15, %s137_s15, %s138_s16  }
   0xd   :  { %132 = dma.done.wait [#allocation3], 256  }
   0xe   :  { %133 = vsyncadd [#allocation3], 4294967040  ;;  %v31_v0 = vld [vmem:[#allocation2] sm:$0xff]  ;;  %v32_v1 = vld [vmem:[#allocation2 + $0x8] sm:$0xff]  ;;  %s139_s22 = smov [#allocation5]  }
   0xf   :  { %v33_v2 = vmul.f32 %v31_v0, %v31_v0  ;;  %v34_v3 = vmul.f32 %v32_v1, %v32_v1  ;;  %v82_v11 = vld [vmem:[%s179_s1] ss:$0 sm:$0xff]  ;;  %s70_s23 = sshll.u32 %s139_s22, 4  ;;  %s71_s23 = int_to_ptr.vmem [resolvable:$true] %s70_s23 }
  0x10   :  { %v83_v13 = vld [vmem:[%s180_s2] ss:$0 sm:$0xff]  ;;  %s112_s24 = scalar_lea.vmem %s71_s23, 256  ;;  %p117_p6 = scmp.lt.s32.totalorder %s71_s23, %s71_s23 }
  0x11   :  { %35 = vadd.xlane.f32.xlu0 %v33_v2  ;;  %p113_p5 = scmp.ne.s32.totalorder %s71_s23, %s112_s24  ;;  %p118_p7 = scmp.lt.s32.totalorder %s112_s24, %s112_s24 }
  0x13   :  { %p119_p8 = por %p118_p7, %p117_p6 }
  0x15   :  { %37 = vadd.xlane.f32.xlu0 %v34_v3  ;;  %p120_p9 = pnand %p119_p8, %p113_p5 }
  0x9a   :  { %v36_v4 = vpop.xlane.xlu0 %35 }
  0x9b   :  { %v39_v5 = vmul.f32 0.0078125, %v36_v4 }
  0x9d   :  { %v41_v6 = vadd.f32 1e-05, %v39_v5 }
  0x9e   :  { %v38_v7 = vpop.xlane.xlu0 %37 }
  0x9f   :  { %88 = vrsqrt.f32 %v41_v6  ;;  %v40_v8 = vmul.f32 0.0078125, %v38_v7 }
  0xa1   :  { %v42_v9 = vadd.f32 1e-05, %v40_v8 }
  0xa3   :  { %90 = vrsqrt.f32 %v42_v9 }
  0xac   :  { %v89_v10 = vpop.eup %88 }
  0xad   :  { %v45_v12 = vmul.f32 %v89_v10, %v31_v0 }
  0xaf   :  { %v53_v14 = vmul.f32 %v82_v11, %v45_v12 }
  0xb0   :  { %v91_v15 = vpop.eup %90 }
  0xb1   :  { %v46_v16 = vmul.f32 %v91_v15, %v32_v1  ;;  %v61_v17 = vsub.f32 %v53_v14, %v83_v13 }
  0xb3   :  { %v54_v18 = vmul.f32 %v82_v11, %v46_v16  ;;  %63 = vst [vmem:[#allocation5] sm:$0xff] %v61_v17 }
  0xb5   :  { %v62_v19 = vsub.f32 %v54_v18, %v83_v13 }
  0xb7   :  { %64 = vst [vmem:[#allocation5 + $0x8] sm:$0xff] %v62_v19 }
  0xb8   :  { %123 = shalt.err (!%p120_p9)
}
  0xb9   :  { %76 = dma.vmem_to_hbm [thread:$0]  %s71_s23, 256, %s181_s3, [#allocation4], %s137_s15, %s137_s15, %s138_s16  }
  0xba   :  { %134 = dma.done.wait [#allocation4], 256  }
  0xbb   :  { %135 = vsyncadd [#allocation4], 4294967040 }
  0xbc   :  { %80 = vsyncpa [#allocation3], 1 }
  0xbd   :  { %81 = vsyncpa [#allocation4], 1 }

</bundles_post_ra>
